<compile_context>
chip_gen: v6e
topology: v6e:2x2x1
jax: 0.10.0
libtpu: 0.0.40
codegen_flags: <defaults>
</compile_context>

<pallas_src>
from functools import partial

import numpy as np
import jax
import jax.numpy as jnp
from jax.experimental import pallas as pl
from jax.experimental.pallas import tpu as pltpu

_VMEM = pltpu.MemorySpace.VMEM
_SMEM = pltpu.MemorySpace.SMEM
_VMEM_LIMIT = 32 * 1024 * 1024   # >= v5e 16MiB scoped default, <= v7x 64MiB physical


def _vspec():
    return pl.BlockSpec(memory_space=_VMEM)


# ---------------------------------------------------------------------------
# In-kernel math helpers
# ---------------------------------------------------------------------------
def _erf(x):
    # Abramowitz & Stegun 7.1.26 (|err| < 1.5e-7): exact-GELU semantics to f32 precision.
    a1, a2, a3, a4, a5 = (0.254829592, -0.284496736, 1.421413741,
                          -1.453152027, 1.061405429)
    p = 0.3275911
    ax = jnp.abs(x)
    t = 1.0 / (1.0 + p * ax)
    poly = ((((a5 * t + a4) * t + a3) * t + a2) * t + a1) * t
    y = 1.0 - poly * jnp.exp(-ax * ax)
    return jnp.where(x >= 0, y, -y)


def _gelu(x):
    return 0.5 * x * (1.0 + _erf(x * 0.7071067811865476))


# ---------------------------------------------------------------------------
# Pallas kernels
# ---------------------------------------------------------------------------
def _mm_bias_kernel(a_ref, w_ref, b_ref, o_ref):
    o_ref[...] = (jnp.dot(a_ref[...], w_ref[...],
                          preferred_element_type=jnp.float32) + b_ref[...])


def _embed_kernel(xp_ref, w_ref, pe_ref, o_ref):
    # xp_ref: (1, T+2, C) f32 circular-padded input (one batch row per grid step)
    # w_ref : (3*C, d) bf16 token-conv weight; pe_ref: (T, d) f32 positional embedding
    # The positional-embedding add is fused as the matmul "bias" (PE DMA'd once, not per batch).
    T = o_ref.shape[1]
    C = xp_ref.shape[2]
    acc = pe_ref[...]
    for dk in range(3):
        patch = xp_ref[0, dk:dk + T, :].astype(jnp.bfloat16)
        acc = acc + jnp.dot(patch, w_ref[dk * C:(dk + 1) * C, :],
                            preferred_element_type=jnp.float32)
    o_ref[0] = acc


def _make_branch_kernel(K, period, length, base, N, dff):
    # Fused TimesBlock branch (one pallas_call): Inception1 -> GELU -> Inception2.
    # No im2col in HBM: tap (dh, dw) of the folded (H, W=period) image equals a time
    # shift of (dh-p)*period + (dw-p) on the flattened sequence, masked per dw where
    # the column index wraps.  d_ff intermediate stays in a VMEM scratch.
    p = (K - 1) // 2

    def kern(x_ref, w1_ref, b1_ref, w2_ref, b2_ref, m_ref, o_ref, h_ref):
        # conv1 (fused Inception mean) + GELU
        acc1 = jnp.zeros((length, dff), jnp.float32)
        for dw in range(K):
            part = jnp.zeros((length, dff), jnp.float32)
            for dh in range(K):
                s = base + (dh - p) * period + (dw - p)
                patch = x_ref[0, s:s + length, :].astype(jnp.bfloat16)
                wblk = w1_ref[(dh * K + dw) * N:(dh * K + dw + 1) * N, :]
                part = part + jnp.dot(patch, wblk,
                                      preferred_element_type=jnp.float32)
            acc1 = acc1 + part * m_ref[dw]
        h_ref[...] = jnp.zeros_like(h_ref)
        h_ref[base:base + length, :] = _gelu(acc1 + b1_ref[...])
        # conv2 (fused Inception mean), reading the padded intermediate from VMEM
        acc2 = jnp.zeros((length, N), jnp.float32)
        for dw in range(K):
            part = jnp.zeros((length, N), jnp.float32)
            for dh in range(K):
                s = base + (dh - p) * period + (dw - p)
                patch = h_ref[s:s + length, :].astype(jnp.bfloat16)
                wblk = w2_ref[(dh * K + dw) * dff:(dh * K + dw + 1) * dff, :]
                part = part + jnp.dot(patch, wblk,
                                      preferred_element_type=jnp.float32)
            acc2 = acc2 + part * m_ref[dw]
        o_ref[0] = acc2 + b2_ref[...]

    return kern


def _make_combine_kernel(k, bb, use_mask):
    # Softmax-weighted residual combine + LayerNorm (+ GELU*mask on last layer),
    # bb batch rows per grid step; per-row weights read as scalars from SMEM.
    def kern(*refs):
        w_ref = refs[0]                      # SMEM (k, B)
        res_refs = refs[1:1 + k]             # k blocks (bb, total, N)
        x_ref = refs[1 + k]                  # (bb, total, N)
        g_ref = refs[2 + k]                  # (1, N)
        b_ref = refs[3 + k]                  # (1, N)
        m_ref = refs[4 + k] if use_mask else None
        o_ref = refs[-1]
        i = pl.program_id(0)
        for r in range(bb):
            acc = x_ref[r]
            for j in range(k):
                acc = acc + res_refs[j][r] * w_ref[j, i * bb + r]
            mu = jnp.mean(acc, axis=-1, keepdims=True)
            var = jnp.mean((acc - mu) ** 2, axis=-1, keepdims=True)
            y = (acc - mu) * jax.lax.rsqrt(var + 1e-5) * g_ref[...] + b_ref[...]
            if use_mask:
                y = _gelu(y) * m_ref[r]
            o_ref[r] = y

    return kern


# ---------------------------------------------------------------------------
# Pallas wrappers
# ---------------------------------------------------------------------------
def pallas_matmul_bias(a, w, b2d):
    # TODO(synk): production shapes need a real (tm,tn,tk) grid + f32 VMEM accumulator;
    # at toy sizes a single full-block step is optimal.
    M = a.shape[0]
    N = w.shape[1]
    return pl.pallas_call(
        _mm_bias_kernel,
        out_shape=jax.ShapeDtypeStruct((M, N), jnp.float32),
        in_specs=[_vspec(), _vspec(), _vspec()],
        out_specs=_vspec(),
        compiler_params=pltpu.CompilerParams(vmem_limit_bytes=_VMEM_LIMIT),
    )(a.astype(jnp.bfloat16), w.astype(jnp.bfloat16), b2d.astype(jnp.float32))


def pallas_embed(xp, token_wm, pe):
    Bn, Tp2, C = xp.shape
    T = Tp2 - 2
    d = token_wm.shape[1]
    return pl.pallas_call(
        _embed_kernel,
        out_shape=jax.ShapeDtypeStruct((Bn, T, d), jnp.float32),
        grid=(Bn,),
        in_specs=[pl.BlockSpec((1, Tp2, C), lambda i: (i, 0, 0)),
                  pl.BlockSpec((3 * C, d), lambda i: (0, 0)),
                  pl.BlockSpec((T, d), lambda i: (0, 0))],
        out_specs=pl.BlockSpec((1, T, d), lambda i: (i, 0, 0)),
        compiler_params=pltpu.CompilerParams(
            dimension_semantics=("parallel",), vmem_limit_bytes=_VMEM_LIMIT),
    )(xp.astype(jnp.float32), token_wm, pe)


def _row_block(B):
    bb = 1
    for c in range(2, min(B, 8) + 1):
        if B % c == 0:
            bb = c
    return bb


def pallas_combine_ln(res_list, w_kb, x, g, b, mask=None):
    k = len(res_list)
    B, total, N = x.shape
    bb = _row_block(B)
    in_specs = [pl.BlockSpec(memory_space=_SMEM)]
    in_specs += [pl.BlockSpec((bb, total, N), lambda i: (i, 0, 0)) for _ in range(k)]
    in_specs += [pl.BlockSpec((bb, total, N), lambda i: (i, 0, 0)),
                 pl.BlockSpec((1, N), lambda i: (0, 0)),
                 pl.BlockSpec((1, N), lambda i: (0, 0))]
    args = [w_kb.astype(jnp.float32)] + [r.astype(jnp.float32) for r in res_list]
    args += [x.astype(jnp.float32), g, b]
    if mask is not None:
        in_specs.append(pl.BlockSpec((bb, total, 1), lambda i: (i, 0, 0)))
        args.append(mask.astype(jnp.float32))
    return pl.pallas_call(
        _make_combine_kernel(k, bb, mask is not None),
        out_shape=jax.ShapeDtypeStruct((B, total, N), jnp.float32),
        grid=(B // bb,),
        in_specs=in_specs,
        out_specs=pl.BlockSpec((bb, total, N), lambda i: (i, 0, 0)),
        compiler_params=pltpu.CompilerParams(
            dimension_semantics=("parallel",), vmem_limit_bytes=_VMEM_LIMIT),
    )(*args)


# ---------------------------------------------------------------------------
# Model building blocks
# ---------------------------------------------------------------------------
def positional_embedding(T, d):
    pos = np.arange(T, dtype=np.float32)[:, None]
    div = np.exp(np.arange(0, d, 2, dtype=np.float32) * (-(np.log(10000.0) / d)))
    pe = np.zeros((T, d), np.float32)
    pe[:, 0::2] = np.sin(pos * div)
    pe[:, 1::2] = np.cos(pos * div)[:, :d // 2]
    return jnp.asarray(pe)


@jax.jit
def _embed(x_enc, token_wm, pe):
    # Conv1d(c_in->d_model, k=3, circular pad, no bias) + positional embedding (fused).
    xp = jnp.concatenate([x_enc[:, -1:, :], x_enc, x_enc[:, :1, :]], axis=1)
    return pallas_embed(xp, token_wm, pe)


@partial(jax.jit, static_argnums=(5,))
def _period_branch(x, w1m, b1, w2m, b2, period):
    # One TimesBlock branch, fully fused into one pallas_call (see _make_branch_kernel).
    Bn, total, N = x.shape
    dff = w1m.shape[1]
    K = int(round((w1m.shape[0] // N) ** 0.5))
    p = (K - 1) // 2
    length = total if total % period == 0 else (total // period + 1) * period
    pad_needed = p * period + p
    base = ((pad_needed + 7) // 8) * 8           # sublane-aligned left pad
    Lpad = base + length + base
    xpad = jnp.pad(x.astype(jnp.float32),
                   ((0, 0), (base, base + length - total), (0, 0)))
    # per-dw column-validity masks (static: period/length are Python ints here)
    t = np.arange(length)
    wc = t % period
    masks = np.stack([((wc + dw - p >= 0) & (wc + dw - p < period)).astype(np.float32)
                      for dw in range(K)], axis=0)[..., None]      # (K, length, 1)
    masks = jnp.asarray(masks)

    out = pl.pallas_call(
        _make_branch_kernel(K, period, length, base, N, dff),
        out_shape=jax.ShapeDtypeStruct((Bn, length, N), jnp.float32),
        grid=(Bn,),
        in_specs=[
            pl.BlockSpec((1, Lpad, N), lambda i: (i, 0, 0)),
            pl.BlockSpec((K * K * N, dff), lambda i: (0, 0)),
            pl.BlockSpec((1, dff), lambda i: (0, 0)),
            pl.BlockSpec((K * K * dff, N), lambda i: (0, 0)),
            pl.BlockSpec((1, N), lambda i: (0, 0)),
            pl.BlockSpec((K, length, 1), lambda i: (0, 0, 0)),
        ],
        out_specs=pl.BlockSpec((1, length, N), lambda i: (i, 0, 0)),
        scratch_shapes=[pltpu.VMEM((Lpad, dff), jnp.float32)],
        compiler_params=pltpu.CompilerParams(
            dimension_semantics=("parallel",), vmem_limit_bytes=_VMEM_LIMIT),
    )(xpad, w1m, b1, w2m, b2, masks)
    return out[:, :total, :]


@jax.jit
def _combine_ln_jit(res, period_weight, x, g, b):
    w_kb = jax.nn.softmax(period_weight, axis=1).T                 # (k, B)
    return pallas_combine_ln(list(res), w_kb, x, g, b)


@jax.jit
def _head_jit(res, period_weight, x, g, b, mask3, proj_wm, proj_b2):
    # Last layer: combine + LayerNorm + GELU*mask fused, then lane-padded projection.
    w_kb = jax.nn.softmax(period_weight, axis=1).T
    out = pallas_combine_ln(list(res), w_kb, x, g, b, mask=mask3)  # (B, T, N)
    flat = out.reshape(out.shape[0], -1).astype(jnp.bfloat16)
    logits = pallas_matmul_bias(flat, proj_wm, proj_b2)
    return logits[:, :100]                   # un-pad: nn.Linear(d_model*seq_len, 100)


@partial(jax.jit, static_argnums=(1,))
def _fft_stats(x, k):
    xf = jnp.fft.rfft(x, axis=1)
    amp = jnp.abs(xf)
    freq = amp.mean(axis=0).mean(axis=-1)
    freq = freq.at[0].set(0.0)
    _, top = jax.lax.top_k(freq, k)
    pw = jnp.take(amp.mean(axis=-1), top, axis=1)                  # (B, k)
    return top, pw


def fft_for_period(x, k):
    # TODO(synk): FFT + top-k force a device->host sync because the chosen periods
    # define *static* reshape/conv shapes; stays in XLA + host (matches torch semantics).
    top, period_weight = _fft_stats(x, k)
    top_np = np.asarray(jax.device_get(top))
    top_np = np.maximum(top_np, 1)        # guard: avoid T // 0 on degenerate spectra
    period = x.shape[1] // top_np
    return period, period_weight


def model_forward(params, cfg, x_enc, x_mark_enc, x_dec=None, x_mark_dec=None,
                  mask=None):
    assert cfg['task_name'] == 'classification'
    Bn, T, _ = x_enc.shape
    k = cfg['top_k']
    mask3 = x_mark_enc.reshape(Bn, T, 1).astype(jnp.float32)

    enc = _embed(x_enc, params['token_wm'], params['pe'])          # DataEmbedding
    logits = None
    for l in range(cfg['e_layers']):
        blk = params['blocks'][l]
        period_list, period_weight = fft_for_period(enc, k)
        res = tuple(
            _period_branch(enc, blk['w1m'], blk['b1'], blk['w2m'], blk['b2'],
                           int(per))
            for per in period_list)
        if l < cfg['e_layers'] - 1:
            enc = _combine_ln_jit(res, period_weight, enc,
                                  params['ln_g'], params['ln_b'])
        else:
            logits = _head_jit(res, period_weight, enc,
                               params['ln_g'], params['ln_b'], mask3,
                               params['proj_wm'], params['proj_b2'])
    return logits


# ---------------------------------------------------------------------------
# Parameters: torch-layout init + one-time prep into fused matmul layouts
# ---------------------------------------------------------------------------
def init_params(key, cfg):
    d, dff, cin = cfg['d_model'], cfg['d_ff'], cfg['enc_in']
    nk, L, T = cfg['num_kernels'], cfg['e_layers'], cfg['seq_len']
    keys = iter(jax.random.split(key, 8 + L * 4 * nk))

    def rnd(shape, scale=0.05):
        return scale * jax.random.normal(next(keys), shape, jnp.float32)

    params = {
        'token_w': rnd((d, cin, 3)),                 # Conv1d weight [out, in, k]
        'ln_g': jnp.ones((d,), jnp.float32),
        'ln_b': jnp.zeros((d,), jnp.float32),
        'proj_w': rnd((100, d * T)),                 # Linear(d_model*seq_len, 100)
        'proj_b': rnd((100,)),
        'blocks': [],
    }
    for _ in range(L):
        blk = {'inc1_w': [], 'inc1_b': [], 'inc2_w': [], 'inc2_b': []}
        for i in range(nk):
            ks = 2 * i + 1
            blk['inc1_w'].append(rnd((dff, d, ks, ks)))
            blk['inc1_b'].append(rnd((dff,)))
            blk['inc2_w'].append(rnd((d, dff, ks, ks)))
            blk['inc2_b'].append(rnd((d,)))
        params['blocks'].append(blk)
    return params


def _fuse_inception(ws, bs, K):
    # mean of same-padded convs (k=1,3,..,K) == one conv with the mean of zero-padded
    # kernels (linearity) -> one KxK "tap table" of shape (K*K*Cin, Cout).
    nk = len(ws)
    Cout, Cin = ws[0].shape[0], ws[0].shape[1]
    wacc = jnp.zeros((Cout, Cin, K, K), jnp.float32)
    bacc = jnp.zeros((Cout,), jnp.float32)
    for w, b in zip(ws, bs):
        kk = w.shape[-1]
        p = (K - kk) // 2
        wacc = wacc + jnp.pad(w.astype(jnp.float32),
                              ((0, 0), (0, 0), (p, p), (p, p)))
        bacc = bacc + b.astype(jnp.float32)
    wm = jnp.transpose(wacc / nk, (2, 3, 1, 0)).reshape(K * K * Cin, Cout)
    return wm, (bacc / nk).reshape(1, Cout)


def prepare_params(raw, cfg):
    d, cin, nk, T = cfg['d_model'], cfg['enc_in'], cfg['num_kernels'], cfg['seq_len']
    K = 2 * (nk - 1) + 1
    n_cls = raw['proj_b'].shape[0]
    n_pad = ((n_cls + 127) // 128) * 128
    prep = {
        'token_wm': jnp.transpose(raw['token_w'], (2, 1, 0))
                       .reshape(3 * cin, d).astype(jnp.bfloat16),
        'pe': positional_embedding(T, d),
        'ln_g': raw['ln_g'].reshape(1, d).astype(jnp.float32),
        'ln_b': raw['ln_b'].reshape(1, d).astype(jnp.float32),
        # lane-dense projection: pad 100-wide output to 128 columns, sliced after
        'proj_wm': jnp.pad(raw['proj_w'].T.astype(jnp.float32),
                           ((0, 0), (0, n_pad - n_cls))).astype(jnp.bfloat16),
        'proj_b2': jnp.pad(raw['proj_b'].astype(jnp.float32),
                           (0, n_pad - n_cls)).reshape(1, n_pad),
        'blocks': [],
    }
    for blk in raw['blocks']:
        w1m, b1 = _fuse_inception(blk['inc1_w'], blk['inc1_b'], K)
        w2m, b2 = _fuse_inception(blk['inc2_w'], blk['inc2_b'], K)
        prep['blocks'].append(dict(w1m=w1m.astype(jnp.bfloat16), b1=b1,
                                   w2m=w2m.astype(jnp.bfloat16), b2=b2))
    return prep


if __name__ == "__main__":
    cfg = dict(task_name='classification', seq_len=16, pred_len=0, top_k=2,
               d_model=16, d_ff=32, num_kernels=3, e_layers=2, enc_in=4,
               embed='timeF', freq='h', dropout=0.1)

    key = jax.random.PRNGKey(0)
    kp, kx = jax.random.split(key)
    raw_params = init_params(kp, cfg)
    params = prepare_params(raw_params, cfg)   # one-time weight fusion / re-layout

    B = 2
    x_enc = jax.random.normal(kx, (B, cfg['seq_len'], cfg['enc_in']), jnp.float32)
    x_mark_enc = jnp.ones((B, cfg['seq_len']), jnp.float32)   # padding mask

    logits = model_forward(params, cfg, x_enc, x_mark_enc, None, None)
    jax.block_until_ready(logits)
    assert logits.shape == (B, 100)
    assert bool(jnp.all(jnp.isfinite(logits)))
    print("KERNEL_OK")
</pallas_src>

<mosaic_0001>
module attributes {stable_mosaic.version = 11 : i64} {
  func.func @_embed_kernel(%arg0: i32, %arg1: memref<1x18x4xf32, #tpu.memory_space<vmem>>, %arg2: memref<12x16xbf16, #tpu.memory_space<vmem>>, %arg3: memref<16x16xf32, #tpu.memory_space<vmem>>, %arg4: memref<1x16x16xf32, #tpu.memory_space<vmem>>) attributes {dimension_semantics = [#tpu.dimension_semantics<parallel>], iteration_bounds = array<i64: 2>, scalar_prefetch = 0 : i64, scratch_operands = 0 : i64, tpu.core_type = #tpu.core_type<tc>, window_params = [{transform_indices = @transform_0, window_bounds = array<i64: 1, 18, 4>}, {pipeline_mode = #tpu.pipeline_mode<synchronous>, transform_indices = @transform_1, window_bounds = array<i64: 12, 16>}, {pipeline_mode = #tpu.pipeline_mode<synchronous>, transform_indices = @transform_2, window_bounds = array<i64: 16, 16>}, {transform_indices = @transform_3, window_bounds = array<i64: 1, 16, 16>}]} {
    %c0 = arith.constant 0 : index
    %c0_0 = arith.constant 0 : index
    %0 = vector.load %arg3[%c0, %c0_0] : memref<16x16xf32, #tpu.memory_space<vmem>>, vector<16x16xf32>
    %c0_1 = arith.constant 0 : index
    %c0_2 = arith.constant 0 : index
    %c0_3 = arith.constant 0 : index
    %1 = vector.load %arg1[%c0_1, %c0_2, %c0_3] : memref<1x18x4xf32, #tpu.memory_space<vmem>>, vector<1x16x4xf32>
    %2 = vector.shape_cast %1 : vector<1x16x4xf32> to vector<16x4xf32>
    %3 = arith.truncf %2 : vector<16x4xf32> to vector<16x4xbf16>
    %c0_4 = arith.constant 0 : index
    %c0_5 = arith.constant 0 : index
    %4 = vector.load %arg2[%c0_4, %c0_5] : memref<12x16xbf16, #tpu.memory_space<vmem>>, vector<4x16xbf16>
    %cst = arith.constant dense<0.000000e+00> : vector<16x16xf32>
    %5 = tpu.matmul %3, %4, %cst {dimension_numbers = #tpu.dot_dimension_numbers<[1], [0], [0], [1], [0, 0, 1, 1], [], []>} : vector<16x4xbf16>, vector<4x16xbf16>, vector<16x16xf32> -> vector<16x16xf32>
    %6 = arith.addf %0, %5 : vector<16x16xf32>
    %c0_6 = arith.constant 0 : index
    %c1 = arith.constant 1 : index
    %c0_7 = arith.constant 0 : index
    %7 = vector.load %arg1[%c0_6, %c1, %c0_7] : memref<1x18x4xf32, #tpu.memory_space<vmem>>, vector<1x16x4xf32>
    %8 = vector.shape_cast %7 : vector<1x16x4xf32> to vector<16x4xf32>
    %9 = arith.truncf %8 : vector<16x4xf32> to vector<16x4xbf16>
    %c4 = arith.constant 4 : index
    %c0_8 = arith.constant 0 : index
    %10 = vector.load %arg2[%c4, %c0_8] : memref<12x16xbf16, #tpu.memory_space<vmem>>, vector<4x16xbf16>
    %cst_9 = arith.constant dense<0.000000e+00> : vector<16x16xf32>
    %11 = tpu.matmul %9, %10, %cst_9 {dimension_numbers = #tpu.dot_dimension_numbers<[1], [0], [0], [1], [0, 0, 1, 1], [], []>} : vector<16x4xbf16>, vector<4x16xbf16>, vector<16x16xf32> -> vector<16x16xf32>
    %12 = arith.addf %6, %11 : vector<16x16xf32>
    %c0_10 = arith.constant 0 : index
    %c2 = arith.constant 2 : index
    %c0_11 = arith.constant 0 : index
    %13 = vector.load %arg1[%c0_10, %c2, %c0_11] : memref<1x18x4xf32, #tpu.memory_space<vmem>>, vector<1x16x4xf32>
    %14 = vector.shape_cast %13 : vector<1x16x4xf32> to vector<16x4xf32>
    %15 = arith.truncf %14 : vector<16x4xf32> to vector<16x4xbf16>
    %c8 = arith.constant 8 : index
    %c0_12 = arith.constant 0 : index
    %16 = vector.load %arg2[%c8, %c0_12] : memref<12x16xbf16, #tpu.memory_space<vmem>>, vector<4x16xbf16>
    %cst_13 = arith.constant dense<0.000000e+00> : vector<16x16xf32>
    %17 = tpu.matmul %15, %16, %cst_13 {dimension_numbers = #tpu.dot_dimension_numbers<[1], [0], [0], [1], [0, 0, 1, 1], [], []>} : vector<16x4xbf16>, vector<4x16xbf16>, vector<16x16xf32> -> vector<16x16xf32>
    %18 = arith.addf %12, %17 : vector<16x16xf32>
    %c0_14 = arith.constant 0 : index
    %c0_15 = arith.constant 0 : index
    %c0_16 = arith.constant 0 : index
    %19 = vector.load %arg4[%c0_14, %c0_15, %c0_16] : memref<1x16x16xf32, #tpu.memory_space<vmem>>, vector<1x16x16xf32>
    %20 = vector.shape_cast %19 : vector<1x16x16xf32> to vector<16x16xf32>
    %21 = vector.shape_cast %18 : vector<16x16xf32> to vector<1x16x16xf32>
    tpu.vector_store %arg4[%c0_14, %c0_15, %c0_16], %21 {strides = array<i32>} : memref<1x16x16xf32, #tpu.memory_space<vmem>>, vector<1x16x16xf32>,
    return
  }
  func.func @transform_0(%arg0: i32) -> (i32, i32, i32) {
    %c0_i32 = arith.constant 0 : i32
    %c0_i32_0 = arith.constant 0 : i32
    %c0_i32_1 = arith.constant 0 : i32
    return %arg0, %c0_i32, %c0_i32_0 : i32, i32, i32
  }
  func.func @transform_1(%arg0: i32) -> (i32, i32) {
    %c0_i32 = arith.constant 0 : i32
    %c0_i32_0 = arith.constant 0 : i32
    %c0_i32_1 = arith.constant 0 : i32
    return %c0_i32, %c0_i32_0 : i32, i32
  }
  func.func @transform_2(%arg0: i32) -> (i32, i32) {
    %c0_i32 = arith.constant 0 : i32
    %c0_i32_0 = arith.constant 0 : i32
    %c0_i32_1 = arith.constant 0 : i32
    return %c0_i32, %c0_i32_0 : i32, i32
  }
  func.func @transform_3(%arg0: i32) -> (i32, i32, i32) {
    %c0_i32 = arith.constant 0 : i32
    %c0_i32_0 = arith.constant 0 : i32
    %c0_i32_1 = arith.constant 0 : i32
    return %arg0, %c0_i32, %c0_i32_0 : i32, i32, i32
  }
}

</mosaic_0001>

<bundles_post_ra>
// kernel: _embed.1
= control target key start
LH: loop header
LB: loop body
LE: loop exit
PB: predicated region body
PF: predicated region fallthrough
CT: control target
= control target key end

     0   :  { %8 = vsyncpa [#allocation3], 0  ;;  %s711_s0 = inlined_call_operand.vmem [shape: f32[2,18,4], index: 0, kind: input, shape index: {}]   ;;  %s712_s1 = inlined_call_operand.vmem [shape: bf16[12,16], index: 1, kind: input, shape index: {}]   ;;  %s713_s2 = inlined_call_operand.vmem [shape: f32[16,16], index: 2, kind: input, shape index: {}]   ;;  %s714_s3 = inlined_call_operand.hbm [shape: f32[2,16,16], index: 3, kind: output, shape index: {}]  }
   0x1   :  { %10 = vsyncpa [#allocation3 + $0x1], 0  ;;  %s588_s12 = smov 0   ;;  %s590_s13 = smov 0  }
   0x2   :  { %s592_s14 = smov 0   ;;  %s594_s15 = smov 0  }
   0x3 LB: > { %s609_s16 = sadd.s32 4294967295, %s561_s15   ;;  %s416_s17 = sadd.s32 4294967294, %s561_s15   ;;  %s561_s15 = sphi %s594_s15, %s720_s15   ;;  %s557_s14 = sphi %s592_s14, %s719_s14   ;;  %s553_s13 = sphi %s590_s13, %s718_s13   ;;  %s549_s12 = sphi %s588_s12, %s717_s12  }
   0x4   : > { %s613_s18 = sadd.s32 1, %s561_s15   ;;  %s91_s19 = sadd.s32 1, %s557_s14 }
   0x5   : > { %s88_s20 = ssub.s32 %s561_s15, %s613_s18  ;;  %p101_p0 = scmp.ne.s32.totalorder %s557_s14, %s553_s13 }
   0x6   : > { %p89_p1 = scmp.eq.s32.totalorder %s88_s20, 0  ;;  %p102_p2 = scmp.eq.s32.totalorder %s609_s16, 1 }
   0x7   : > { %p107_p3 = scmp.ne.s32.totalorder %s553_s13, %s549_s12  ;;  %p108_p4 = scmp.eq.s32.totalorder %s416_s17, 1 }
   0x8   : > { %s624_s21 = scalar_select %p89_p1, %s557_s14, %s91_s19  }
   0x9   : > { %p626_p5 = por %p102_p2, %p101_p0  ;;  %p630_p6 = por %p108_p4, %p107_p3 }
   0xa   : > { %p419_p7 = scmp.ge.s32.totalorder %s561_s15, 1  ;;  %p140_p8 = scmp.lt.s32.totalorder %s561_s15, 3 }
   0xc   : > { %p141_p9 = pnand %p419_p7, %p140_p8 }
   0xd   : > { %p164_p10 = scmp.lt.s32.totalorder (!%p141_p9), %s609_s16, 1  ;;  %s161_s10 = sand.u32 (!%p141_p9), 1, %s553_s13  }
   0xe   : > { %144 = sbr.rel (%p141_p9) target bundleno = 248 (0xf8), region = 32  ;;  %s420_s19 = sshll.u32 (!%p141_p9), %s161_s10, 4 }
   0xf   : > { %s163_s20 = scalar_lea.vmem (!%p141_p9), [#allocation2], %s420_s19  ;;  %s431_s25 = sshll.u32 (!%p141_p9), %s609_s16, 8 }
  0x10   : > { %s354_s24 = sshll.u32 (!%p141_p9), %s163_s20, 4  ;;  %s664_s24 = int_to_ptr.vmem [resolvable:$true] %s354_s24 }
  0x11   : > { %s501_s30 = scalar_lea.vmem (!%p141_p9), %s664_s24, 256 }
  0x12   : > { %p502_p11 = scmp.ne.s32.totalorder (!%p141_p9), %s664_s24, %s501_s30 }
  0x13   : > { %v175_v0 = vld [vmem:[%s712_s1] sm:$0x3]  ;;  %vm180_vm0 = vcmask 1041408   ;;  %v563_v1 = vmov 0.0   ;;  %vm564_vm1 = vmmov 0   ;;  %s165_s28 = scalar_select %p164_p10, %s609_s16, 1 }
  0x14   : > { %438 = vmatprep.subr.bf16.mxu0 %v563_v1  ;;  %v182_v2 = vsel %vm180_vm0, %v175_v0, 0  ;;  %444 = vmatprep.subr.bf16.mxu1 %v563_v1  ;;  %v500_v3 = vld [vmem:[%s712_s1] ss:$0 sps:$4 sm:$0xcc]   ;;  %v287_v6 = vld [vmem:[%s712_s1 + $0x4] sm:$0x3]  ;;  %p503_p12 = pnand %p502_p11, %p626_p5 }
  0x15   : > { %439 = vmatpush3.bf16.msra.mxu0 %v182_v2  ;;  %440 = vmatprep.mubr.msk.bf16.mxu0 %vm564_vm1, %v563_v1  ;;  %v234_v4 = vrot.slane %v500_v3, 2  ;;  %s456_s29 = smul.u32 24, %s165_s28  ;;  %vm176_vm2 = vcmask 31744   ;;  %v292_v12 = vsel %vm180_vm0, %v287_v6, 0  ;;  %v170_v17 = vld [vmem:[%s713_s2] sm:$0xff]  ;;  %v171_v23 = vld [vmem:[%s713_s2 + $0x8] sm:$0xff]  ;;  %s669_s28 = scalar_lea.hbm %s714_s3, %s431_s25 }
  0x16   : > { %446 = vmatprep.mubr.msk.bf16.mxu1 %vm564_vm1, %v563_v1  ;;  %450 = vmatprep.subr.bf16.mxu0 %v563_v1  ;;  %vm337_vm3 = vcmask 130048   ;;  %p504_p13 = pneg %p503_p12  ;;  %s565_s16 = smov [#allocation2]  }
  0x17   : > { %v239_v5 = vsel %vm180_vm0, %v234_v4, 0  ;;  %s168_s7 = scalar_lea.vmem %s711_s0, %s456_s29  ;;  %s671_s29 = scalar_lea.sflag [#allocation3], %s161_s10 }
  0x18   : > { %445 = vmatpush3.bf16.msra.mxu1 %v239_v5  ;;  %v172_v7 = vld [vmem:[%s168_s7] sm:$0xff]  ;;  %v173_v8 = vld [vmem:[%s168_s7 + $0x8] sm:$0xff]  ;;  %s505_s4 = sshll.u32 %s565_s16, 4  ;;  %s506_s4 = int_to_ptr.vmem [resolvable:$false] %s505_s4 }
  0x19   : > { %v227_v9 = vld [vmem:[%s168_s7 + $0x1] sm:$0xff]  ;;  %v174_v10 = vpack.c.bf16 %v173_v8, %v172_v7  ;;  %v228_v11 = vld [vmem:[%s168_s7 + $0x9] sm:$0xff]  ;;  %s507_s5 = scalar_lea.vmem %s506_s4, 512  ;;  %p508_p0 = scmp.lt.s32.totalorder %s664_s24, %s506_s4 }
  0x1a   : > { %v229_v13 = vpack.c.bf16 %v228_v11, %v227_v9  ;;  %v284_v14 = vld [vmem:[%s168_s7 + $0x2] sm:$0xff]  ;;  %v285_v15 = vld [vmem:[%s168_s7 + $0xa] sm:$0xff]  ;;  %p509_p1 = scmp.lt.s32.totalorder %s507_s5, %s501_s30 }
  0x1b   : > { %441 = vmatmul.mubr.msk.bf16.vlgmr.msra.gmra.mxu0 %vm176_vm2, %v174_v10  ;;  %v286_v16 = vpack.c.bf16 %v285_v15, %v284_v14 }
  0x1c   : > { %447 = vmatmul.mubr.msk.bf16.vlgmr.msra.gmra.mxu1 %vm176_vm2, %v229_v13  ;;  %451 = vmatpush3.bf16.msra.mxu0 %v292_v12  ;;  %p510_p2 = por %p509_p1, %p508_p0 }
  0x1d   : > { %452 = vmatprep.mubr.msk.bf16.mxu0 %vm564_vm1, %v563_v1 }
  0x1e   : > { %p511_p3 = pnand %p510_p2, %p504_p13 }
  0x23   : > { %453 = vmatmul.mubr.msk.bf16.vlgmr.msra.gmra.mxu0 %vm176_vm2, %v286_v16 }
  0xdb   : > { %v218_v18 = vpop.f32.mrf.mxu0 }
  0xdc   : > { %v275_v19 = vpop.f32.mrf.mxu1  ;;  %v225_v21 = vadd.f32 %v218_v18, %v170_v17 }
  0xdd   : > { %v442_v20 = vpop.f32.mrf.mxu0 }
  0xde   : > { %v448_v22 = vpop.f32.mrf.mxu1  ;;  %v282_v27 = vadd.f32 %v275_v19, %v225_v21 }
  0xdf   : > { %v221_v24 = vpop.f32.mrf.mxu0 }
  0xe0   : > { %v278_v25 = vpop.f32.mrf.mxu1  ;;  %v226_v28 = vadd.f32 %v221_v24, %v171_v23 }
  0xe1   : > { %v443_v26 = vpop.f32.mrf.mxu0 }
  0xe2   : > { %v449_v29 = vpop.f32.mrf.mxu1  ;;  %v283_v33 = vadd.f32 %v278_v25, %v226_v28 }
  0xe3   : > { %v328_v30 = vpop.f32.mrf.mxu0 }
  0xe4   : > { %v335_v31 = vadd.f32 %v328_v30, %v282_v27 }
  0xe5   : > { %v454_v32 = vpop.f32.mrf.mxu0 }
  0xe6   : > { %338 = vst.msk [vmem:[%s163_s20] sm:$0xff] %vm337_vm3, %v335_v31 }
  0xe7   : > { %v331_v34 = vpop.f32.mrf.mxu0 }
  0xe8   : > { %v336_v35 = vadd.f32 %v331_v34, %v283_v33 }
  0xe9   : > { %v455_v36 = vpop.f32.mrf.mxu0 }
  0xea   : > { %339 = vst.msk [vmem:[%s163_s20 + $0x8] sm:$0xff] %vm337_vm3, %v336_v35 }
  0xeb   : > { %514 = shalt.err (!%p511_p3)
}
  0xec   : > { %s515_s6 = scalar_lea.hbm %s669_s28, 256  ;;  %s519_s9 = scalar_lea.hbm %s714_s3, 512 }
  0xed   : > { %p516_p4 = scmp.ne.s32.totalorder %s669_s28, %s515_s6  ;;  %p520_p9 = scmp.lt.s32.totalorder %s669_s28, %s714_s3 }
  0xee   : > { %p521_p10 = scmp.lt.s32.totalorder %s519_s9, %s515_s6 }
  0xef   : > { %p517_p7 = pnand %p516_p4, %p626_p5 }
  0xf0   : > { %p522_p11 = por %p521_p10, %p520_p9 }
  0xf1   : > { %p518_p8 = pneg %p517_p7 }
  0xf3   : > { %p523_p12 = pnand %p522_p11, %p518_p8 }
  0xf5   : > { %526 = shalt.err (!%p523_p12)
}
  0xf6   : > { %s566_s17 = smov 128   ;;  %s567_s19 = smov 8  }
  0xf7   : > { %457 = dma.vmem_to_hbm [thread:$0]  (%p626_p5), %s664_s24, 256, %s669_s28, %s671_s29, %s566_s17, %s566_s17, %s567_s19  }
  0xf8 PF: > { %p463_p13 = scmp.ge.s32.totalorder %s561_s15, 2  ;;  %s369_s20 = sand.u32 1, %s549_s12  }
  0xf9   : > { %s370_s25 = scalar_lea.sflag [#allocation3], %s369_s20 }
  0xfa   : > { %p460_p0 = pnand %p463_p13, %p630_p6 }
  0xfc   : > { %p461_p1 = pneg %p460_p0 }
  0xfe   : > { %544 = dma.done.wait (%p461_p1), %s370_s25, 256  }
  0xff   : > { %546 = vsyncadd (%p461_p1), %s370_s25, 4294967040  ;;  %p13_p2 = scmp.ge.s32.totalorder %s613_s18, 4   ;;  %s717_s12 = smov %s553_s13 }
 0x100   : > { %s718_s13 = smov %s557_s14  ;;  %s719_s14 = smov %s624_s21 }
 0x101   : > { %s720_s15 = smov %s613_s18  ;;  %15 = sbr.rel (!%p13_p2) target bundleno = 3 (0x3), region = 67 }
 0x106   :  { %375 = vsyncpa [#allocation3], 1 }
 0x107   :  { %377 = vsyncpa [#allocation3 + $0x1], 1 }

</bundles_post_ra>
